<compile_context>
chip_gen: v5e
topology: v5e:2x2
jax: 0.10.0
libtpu: 0.0.40
codegen_flags: <defaults>
</compile_context>

<pallas_src>
import jax
import jax.numpy as jnp
from jax.experimental import pallas as pl
from jax.experimental.pallas import tpu as pltpu

BN_EPS = 1e-5


def channel_gate_kernel(x_ref, w1t_ref, b1_ref, w2t_ref, b2_ref, gate_ref):
    # x_ref: (TB, C, HW)   gate_ref: (1, TB, C)
    # Global average pool over the spatial (lane) axis, in native dtype.
    # (For bf16 inputs one would accumulate in f32 via a dot-with-ones on the
    #  MXU; inputs here are f32 so the lane reduction is exact.)
    pooled = jnp.mean(x_ref[...], axis=-1)                                # (TB, C)

    # MLP: Linear(C -> Hp) + ReLU + Linear(Hp -> C); eval-mode BN is already
    # folded into the second linear's weights/bias by the wrapper.
    h = jnp.dot(pooled.astype(jnp.float32), w1t_ref[...],
                preferred_element_type=jnp.float32) + b1_ref[...]         # (TB, Hp)
    h = jnp.maximum(h, 0.0)
    y = jnp.dot(h, w2t_ref[...],
                preferred_element_type=jnp.float32) + b2_ref[...]         # (TB, C)

    gate_ref[...] = y[None].astype(gate_ref.dtype)


def _fold_bn_and_pack(params):
    """Fold eval-mode BN into the 2nd linear; transpose + pad hidden to %8."""
    w1, b1, w2, b2, gamma, beta, rmean, rvar = params
    hidden, c = w1.shape

    scale = gamma * jax.lax.rsqrt(rvar + BN_EPS)            # (C,)
    w2f = w2 * scale[:, None]                               # (C, hidden)
    b2f = scale * (b2 - rmean) + beta                       # (C,)

    hp = max(8, ((hidden + 7) // 8) * 8)                    # non-degenerate MXU N
    w1t = jnp.zeros((c, hp), jnp.float32).at[:, :hidden].set(w1.T)
    b1p = jnp.zeros((1, hp), jnp.float32).at[0, :hidden].set(b1)
    w2ft = jnp.zeros((hp, c), jnp.float32).at[:hidden, :].set(w2f.T)
    b2fp = b2f.reshape(1, c).astype(jnp.float32)
    return w1t, b1p, w2ft, b2fp


def channel_gate_scores(x, params, *, x_block_budget_bytes=8 * 1024 * 1024):
    """Returns the (B, C) channel gate (pre-broadcast)."""
    b, c, h, w = x.shape
    hw = h * w
    x_flat = x.reshape(b, c, hw)

    w1t, b1p, w2ft, b2fp = _fold_bn_and_pack(params)
    hp = w1t.shape[1]

    # Pack as many batch elements per block as the VMEM budget allows
    # (double-buffered x block must stay well under the scoped limit).
    itemsize = x.dtype.itemsize
    max_tb = max(1, x_block_budget_bytes // (c * hw * itemsize))
    tb = 1
    for d in range(1, b + 1):
        if b % d == 0 and d <= max_tb:
            tb = d
    nb = b // tb

    full = lambda i: (0, 0)  # replicated (full-array) operands

    gate3 = pl.pallas_call(
        channel_gate_kernel,
        out_shape=jax.ShapeDtypeStruct((nb, tb, c), x.dtype),
        grid_spec=pltpu.PrefetchScalarGridSpec(
            num_scalar_prefetch=0,
            grid=(nb,),
            in_specs=[
                pl.BlockSpec((tb, c, hw), lambda i: (i, 0, 0)),   # x
                pl.BlockSpec((c, hp), full),                      # W1^T (padded)
                pl.BlockSpec((1, hp), full),                      # b1   (padded)
                pl.BlockSpec((hp, c), full),                      # (BN∘W2)^T
                pl.BlockSpec((1, c), full),                       # BN∘b2
            ],
            out_specs=pl.BlockSpec((1, tb, c), lambda i: (i, 0, 0)),
        ),
        compiler_params=pltpu.CompilerParams(
            dimension_semantics=("parallel",),
            vmem_limit_bytes=32 * 1024 * 1024),
    )(x_flat, w1t, b1p, w2ft, b2fp)

    return gate3.reshape(b, c)


def channel_gate(x, params):
    """ChannelGate.forward: per-channel gate expanded to x's shape.

    The broadcast is left to XLA so it can fuse into BAM's consumer
    (x + x * sigmoid(channel_gate + spatial_gate)).
    """
    b, c, h, w = x.shape
    gate = channel_gate_scores(x, params)                   # (B, C)
    return jnp.broadcast_to(gate[:, :, None, None], (b, c, h, w))


def channel_gate_ref(x, params):
    """Pure-JAX reference (eval-mode BN), for correctness check."""
    w1, b1, w2, b2, gamma, beta, rmean, rvar = params
    y = jnp.mean(x, axis=(2, 3))                 # (B, C)
    y = jnp.maximum(y @ w1.T + b1, 0.0)          # (B, hidden)
    y = y @ w2.T + b2                            # (B, C)
    y = gamma * (y - rmean) / jnp.sqrt(rvar + BN_EPS) + beta
    return jnp.broadcast_to(y[:, :, None, None], x.shape)


def make_params(key, channel, reduction=16):
    hidden = channel // reduction
    k1, k2, k3, k4, k5, k6, k7, k8 = jax.random.split(key, 8)
    w1 = jax.random.normal(k1, (hidden, channel), jnp.float32) * 0.1
    b1 = jax.random.normal(k2, (hidden,), jnp.float32) * 0.1
    w2 = jax.random.normal(k3, (channel, hidden), jnp.float32) * 0.1
    b2 = jax.random.normal(k4, (channel,), jnp.float32) * 0.1
    gamma = 1.0 + 0.1 * jax.random.normal(k5, (channel,), jnp.float32)
    beta = 0.1 * jax.random.normal(k6, (channel,), jnp.float32)
    rmean = 0.1 * jax.random.normal(k7, (channel,), jnp.float32)
    rvar = 1.0 + 0.1 * jax.random.uniform(k8, (channel,), jnp.float32)
    return (w1, b1, w2, b2, gamma, beta, rmean, rvar)


if __name__ == "__main__":
    key = jax.random.PRNGKey(0)
    kx, kp = jax.random.split(key)

    B, C, H, W = 2, 32, 16, 16      # channel=32, reduction=16 -> hidden=2
    x = jax.random.normal(kx, (B, C, H, W), jnp.float32)
    params = make_params(kp, C, reduction=16)

    out = channel_gate(x, params)
    out = jax.block_until_ready(out)

    ref = channel_gate_ref(x, params)
    assert out.shape == x.shape
    assert jnp.allclose(out, ref, atol=1e-5, rtol=1e-5), "mismatch vs reference"

    print("KERNEL_OK")
</pallas_src>

<mosaic_0001>
module attributes {stable_mosaic.version = 11 : i64} {
  func.func @channel_gate_kernel(%arg0: i32, %arg1: memref<2x32x256xf32, #tpu.memory_space<vmem>>, %arg2: memref<32x8xf32, #tpu.memory_space<vmem>>, %arg3: memref<1x8xf32, #tpu.memory_space<vmem>>, %arg4: memref<8x32xf32, #tpu.memory_space<vmem>>, %arg5: memref<1x32xf32, #tpu.memory_space<vmem>>, %arg6: memref<1x2x32xf32, #tpu.memory_space<vmem>>) attributes {dimension_semantics = [#tpu.dimension_semantics<parallel>], iteration_bounds = array<i64: 1>, scalar_prefetch = 0 : i64, scratch_operands = 0 : i64, tpu.core_type = #tpu.core_type<tc>, window_params = [{transform_indices = @transform_0, window_bounds = array<i64: 2, 32, 256>}, {pipeline_mode = #tpu.pipeline_mode<synchronous>, transform_indices = @transform_1, window_bounds = array<i64: 32, 8>}, {pipeline_mode = #tpu.pipeline_mode<synchronous>, transform_indices = @transform_2, window_bounds = array<i64: 1, 8>}, {pipeline_mode = #tpu.pipeline_mode<synchronous>, transform_indices = @transform_3, window_bounds = array<i64: 8, 32>}, {pipeline_mode = #tpu.pipeline_mode<synchronous>, transform_indices = @transform_4, window_bounds = array<i64: 1, 32>}, {transform_indices = @transform_5, window_bounds = array<i64: 1, 2, 32>}]} {
    %c0 = arith.constant 0 : index
    %c0_0 = arith.constant 0 : index
    %c0_1 = arith.constant 0 : index
    %0 = vector.load %arg1[%c0, %c0_0, %c0_1] : memref<2x32x256xf32, #tpu.memory_space<vmem>>, vector<2x32x256xf32>
    %cst = arith.constant dense<0.000000e+00> : vector<2x32xf32>
    %1 = vector.multi_reduction <add>, %0, %cst [2] : vector<2x32x256xf32> to vector<2x32xf32>
    %cst_2 = arith.constant 2.560000e+02 : f32
    %2 = vector.broadcast %cst_2 : f32 to vector<2x32xf32>
    %3 = arith.divf %1, %2 : vector<2x32xf32>
    %c0_3 = arith.constant 0 : index
    %c0_4 = arith.constant 0 : index
    %4 = vector.load %arg2[%c0_3, %c0_4] : memref<32x8xf32, #tpu.memory_space<vmem>>, vector<32x8xf32>
    %cst_5 = arith.constant dense<0.000000e+00> : vector<2x8xf32>
    %5 = tpu.matmul %3, %4, %cst_5 {dimension_numbers = #tpu.dot_dimension_numbers<[1], [0], [0], [1], [0, 0, 1, 1], [], []>} : vector<2x32xf32>, vector<32x8xf32>, vector<2x8xf32> -> vector<2x8xf32>
    %c0_6 = arith.constant 0 : index
    %c0_7 = arith.constant 0 : index
    %6 = vector.load %arg3[%c0_6, %c0_7] : memref<1x8xf32, #tpu.memory_space<vmem>>, vector<1x8xf32>
    %7 = vector.broadcast %6 : vector<1x8xf32> to vector<2x8xf32>
    %8 = arith.addf %5, %7 : vector<2x8xf32>
    %cst_8 = arith.constant 0.000000e+00 : f32
    %9 = vector.broadcast %cst_8 : f32 to vector<2x8xf32>
    %10 = arith.maximumf %8, %9 : vector<2x8xf32>
    %c0_9 = arith.constant 0 : index
    %c0_10 = arith.constant 0 : index
    %11 = vector.load %arg4[%c0_9, %c0_10] : memref<8x32xf32, #tpu.memory_space<vmem>>, vector<8x32xf32>
    %cst_11 = arith.constant dense<0.000000e+00> : vector<2x32xf32>
    %12 = tpu.matmul %10, %11, %cst_11 {dimension_numbers = #tpu.dot_dimension_numbers<[1], [0], [0], [1], [0, 0, 1, 1], [], []>} : vector<2x8xf32>, vector<8x32xf32>, vector<2x32xf32> -> vector<2x32xf32>
    %c0_12 = arith.constant 0 : index
    %c0_13 = arith.constant 0 : index
    %13 = vector.load %arg5[%c0_12, %c0_13] : memref<1x32xf32, #tpu.memory_space<vmem>>, vector<1x32xf32>
    %14 = vector.broadcast %13 : vector<1x32xf32> to vector<2x32xf32>
    %15 = arith.addf %12, %14 : vector<2x32xf32>
    %16 = vector.shape_cast %15 : vector<2x32xf32> to vector<1x2x32xf32>
    %c0_14 = arith.constant 0 : index
    %c0_15 = arith.constant 0 : index
    %c0_16 = arith.constant 0 : index
    %17 = vector.load %arg6[%c0_14, %c0_15, %c0_16] : memref<1x2x32xf32, #tpu.memory_space<vmem>>, vector<1x2x32xf32>
    tpu.vector_store %arg6[%c0_14, %c0_15, %c0_16], %16 {strides = array<i32>} : memref<1x2x32xf32, #tpu.memory_space<vmem>>, vector<1x2x32xf32>,
    return
  }
  func.func @transform_0(%arg0: i32) -> (i32, i32, i32) {
    %c0_i32 = arith.constant 0 : i32
    %c0_i32_0 = arith.constant 0 : i32
    %c0_i32_1 = arith.constant 0 : i32
    return %arg0, %c0_i32, %c0_i32_0 : i32, i32, i32
  }
  func.func @transform_1(%arg0: i32) -> (i32, i32) {
    %c0_i32 = arith.constant 0 : i32
    %c0_i32_0 = arith.constant 0 : i32
    %c0_i32_1 = arith.constant 0 : i32
    return %c0_i32, %c0_i32_0 : i32, i32
  }
  func.func @transform_2(%arg0: i32) -> (i32, i32) {
    %c0_i32 = arith.constant 0 : i32
    %c0_i32_0 = arith.constant 0 : i32
    %c0_i32_1 = arith.constant 0 : i32
    return %c0_i32, %c0_i32_0 : i32, i32
  }
  func.func @transform_3(%arg0: i32) -> (i32, i32) {
    %c0_i32 = arith.constant 0 : i32
    %c0_i32_0 = arith.constant 0 : i32
    %c0_i32_1 = arith.constant 0 : i32
    return %c0_i32, %c0_i32_0 : i32, i32
  }
  func.func @transform_4(%arg0: i32) -> (i32, i32) {
    %c0_i32 = arith.constant 0 : i32
    %c0_i32_0 = arith.constant 0 : i32
    %c0_i32_1 = arith.constant 0 : i32
    return %c0_i32, %c0_i32_0 : i32, i32
  }
  func.func @transform_5(%arg0: i32) -> (i32, i32, i32) {
    %c0_i32 = arith.constant 0 : i32
    %c0_i32_0 = arith.constant 0 : i32
    %c0_i32_1 = arith.constant 0 : i32
    return %arg0, %c0_i32, %c0_i32_0 : i32, i32, i32
  }
}

</mosaic_0001>

<bundles_post_ra>
// kernel: tpu_custom_call.1
= control target key start
LH: loop header
LB: loop body
LE: loop exit
PB: predicated region body
PF: predicated region fallthrough
CT: control target
= control target key end

     0   :  { %10 = vsyncpa [#allocation3], 0  ;;  %s329_s0 = inlined_call_operand.hbm [shape: f32[2,32,256], index: 0, kind: input, shape index: {}]   ;;  %s330_s1 = inlined_call_operand.vmem [shape: f32[32,8], index: 1, kind: input, shape index: {}]   ;;  %s331_s2 = inlined_call_operand.vmem [shape: f32[1,8], index: 2, kind: input, shape index: {}]   ;;  %s332_s3 = inlined_call_operand.vmem [shape: f32[8,32], index: 3, kind: input, shape index: {}]   ;;  %s333_s4 = inlined_call_operand.vmem [shape: f32[1,32], index: 4, kind: input, shape index: {}]   ;;  %s334_s5 = inlined_call_operand.hbm [shape: f32[1,2,32], index: 5, kind: output, shape index: {}]  }
   0x1   :  { %11 = vsyncpa [#allocation4], 0  ;;  %s16_s20 = sshll.u32 %s329_s0, 4  ;;  %s267_s21 = smov [#allocation2]   ;;  %s17_s20 = int_to_ptr.hbm [resolvable:$true] %s16_s20 }
   0x2   :  { %s18_s22 = sshll.u32 %s267_s21, 4  ;;  %s268_s23 = smov 256   ;;  %s19_s22 = int_to_ptr.vmem [resolvable:$true] %s18_s22 }
   0x3   :  { %s269_s24 = smov 16  }
   0x4   :  { %24 = dma.hbm_to_vmem [thread:$0]  %s17_s20, 2048, %s19_s22, [#allocation3], %s268_s23, %s268_s23, %s269_s24  }
   0x5   :  { %263 = dma.done.wait [#allocation3], 2048  }
   0x6   :  { %264 = vsyncadd [#allocation3], 4294965248  ;;  %v45_v0 = vld [vmem:[#allocation2 + $0x40] sm:$0xff]  ;;  %v46_v1 = vld [vmem:[#allocation2 + $0x48] sm:$0xff]  ;;  %v270_v25 = vmov 256.0   ;;  %v108_v36 = vlaneseq  ;;  %vm113_vm1 = vcmask 130112  }
   0x7   :  { %v37_v2 = vld [vmem:[#allocation2] sm:$0xff]  ;;  %v65_v3 = vadd.f32 %v46_v1, %v45_v0  ;;  %v38_v4 = vld [vmem:[#allocation2 + $0x8] sm:$0xff]  ;;  %v47_v9 = vld [vmem:[#allocation2 + $0x50] sm:$0xff]  ;;  %213 = vrcp.f32 %v270_v25  ;;  %vm117_vm2 = vcmask 195712   ;;  %vm121_vm3 = vcmask 261312   ;;  %s271_s12 = smov [#allocation5]  }
   0x8   :  { %v41_v5 = vld [vmem:[#allocation2 + $0x20] sm:$0xff]  ;;  %v42_v6 = vld [vmem:[#allocation2 + $0x28] sm:$0xff]  ;;  %v53_v7 = vadd.f32 %v38_v4, %v37_v2  ;;  %v48_v10 = vld [vmem:[#allocation2 + $0x58] sm:$0xff]  ;;  %v109_v38 = vand.u32 127, %v108_v36  ;;  %vm130_vm4 = vcmask 1041409   ;;  %vm132_vm5 = vcmask 261120  }
   0x9   :  { %v59_v8 = vadd.f32 %v42_v6, %v41_v5  ;;  %66 = vadd.xlane.f32.xlu1 %v65_v3  ;;  %v39_v11 = vld [vmem:[#allocation2 + $0x10] sm:$0xff]  ;;  %v40_v12 = vld [vmem:[#allocation2 + $0x18] sm:$0xff]  ;;  %v49_v13 = vld [vmem:[#allocation2 + $0x60] sm:$0xff]  ;;  %v68_v15 = vadd.f32 %v48_v10, %v47_v9  ;;  %vm161_vm6 = vcmask 64512   ;;  %s192_s13 = sshll.u32 %s271_s12, 4  ;;  %vm185_vm7 = vcmask 254976   ;;  %s193_s13 = int_to_ptr.vmem [resolvable:$true] %s192_s13 }
   0xa   :  { %54 = vadd.xlane.f32.xlu0 %v53_v7  ;;  %v50_v14 = vld [vmem:[#allocation2 + $0x68] sm:$0xff]  ;;  %v56_v16 = vadd.f32 %v40_v12, %v39_v11  ;;  %v51_v18 = vld [vmem:[#allocation2 + $0x70] sm:$0xff]  ;;  %v52_v19 = vld [vmem:[#allocation2 + $0x78] sm:$0xff]  ;;  %v111_v41 = vadd.s32 4294967288, %v109_v38  ;;  %v115_v50 = vadd.s32 4294967280, %v109_v38  ;;  %v119_v54 = vadd.s32 4294967272, %v109_v38 }
   0xb   :  { %60 = vadd.xlane.f32.xlu2 %v59_v8  ;;  %v71_v17 = vadd.f32 %v50_v14, %v49_v13  ;;  %v43_v20 = vld [vmem:[#allocation2 + $0x30] sm:$0xff]  ;;  %v44_v21 = vld [vmem:[#allocation2 + $0x38] sm:$0xff]  ;;  %v74_v22 = vadd.f32 %v52_v19, %v51_v18  ;;  %v93_v27 = vld [vmem:[%s330_s1 + $0x8] sm:$0xff] }
   0xc   :  { %v62_v23 = vadd.f32 %v44_v21, %v43_v20  ;;  %v95_v24 = vld [vmem:[%s330_s1 + $0x18] sm:$0xff]  ;;  %v94_v26 = vld [vmem:[%s330_s1 + $0x10] sm:$0xff]  ;;  %v92_v28 = vld [vmem:[%s330_s1] sm:$0xff] }
   0xd   :  { %147 = vmatpush.msra.mxu0 %v95_v24  ;;  %v214_v29 = vpop.eup %213  ;;  %v156_v7 = vld [vmem:[%s332_s3] sm:$0xff]  ;;  %s194_s3 = sshll.u32 %s334_s5, 4  ;;  %s195_s3 = int_to_ptr.hbm [resolvable:$true] %s194_s3 }
   0xe   :  { %v78_v30 = vmul.f32 256.0, %v214_v29  ;;  %vm82_vm0 = vweird.f32 %v214_v29  ;;  %180 = vmatpush.msra.mxu1 %v156_v7  ;;  %v211_v8 = vld [vmem:[%s331_s2] ss:$0 sm:$0xff] }
   0xf   :  { %148 = vmatpush.msra.mxu0 %v94_v26  ;;  %v212_v12 = vld [vmem:[%s333_s4] ss:$0 sm:$0xff] }
  0x10   :  { %v79_v31 = vsub.f32 1.0, %v78_v30 }
  0x11   :  { %69 = vadd.xlane.f32.xlu1 %v68_v15  ;;  %149 = vmatpush.msra.mxu0 %v93_v27 }
  0x12   :  { %57 = vadd.xlane.f32.xlu0 %v56_v16  ;;  %v80_v32 = vmul.f32 %v214_v29, %v79_v31 }
  0x13   :  { %72 = vadd.xlane.f32.xlu2 %v71_v17  ;;  %150 = vmatpush.msra.mxu0 %v92_v28 }
  0x14   :  { %v81_v37 = vadd.f32 %v214_v29, %v80_v32 }
  0x16   :  { %v83_v39 = vsel %vm82_vm0, %v214_v29, %v81_v37 }
  0x19   :  { %75 = vadd.xlane.f32.xlu1 %v74_v22 }
  0x1a   :  { %63 = vadd.xlane.f32.xlu0 %v62_v23 }
  0x7c   :  { %v67_v33 = vpop.xlane.xlu1 %66 }
  0x7d   :  { %v55_v34 = vpop.xlane.xlu0 %54  ;;  %v88_v46 = vmul.f32 %v83_v39, %v67_v33 }
  0x7e   :  { %v61_v35 = vpop.xlane.xlu2 %60  ;;  %v84_v47 = vmul.f32 %v83_v39, %v55_v34 }
  0x7f   :  { %v123_v52 = vperm.slane %v88_v46, %v109_v38  ;;  %v86_v53 = vmul.f32 %v83_v39, %v61_v35 }
  0x80   :  { %v110_v55 = vperm.slane %v84_v47, %v109_v38 }
  0x81   :  { %v116_v63 = vperm.slane %v86_v53, %v115_v50 }
  0x84   :  { %v70_v40 = vpop.xlane.xlu1 %69 }
  0x85   :  { %v89_v42 = vmul.f32 %v83_v39, %v70_v40  ;;  %v58_v43 = vpop.xlane.xlu0 %57 }
  0x86   :  { %v73_v44 = vpop.xlane.xlu2 %72  ;;  %v85_v45 = vmul.f32 %v83_v39, %v58_v43 }
  0x87   :  { %v90_v48 = vmul.f32 %v83_v39, %v73_v44  ;;  %v124_v49 = vperm.slane %v89_v42, %v111_v41 }
  0x88   :  { %v112_v51 = vperm.slane %v85_v45, %v111_v41 }
  0x89   :  { %v126_v56 = vperm.slane %v90_v48, %v115_v50  ;;  %v125_v58 = vsel %vm113_vm1, %v124_v49, %v123_v52 }
  0x8a   :  { %v114_v61 = vsel %vm113_vm1, %v112_v51, %v110_v55 }
  0x8b   :  { %v127_v2 = vsel %vm117_vm2, %v126_v56, %v125_v58  ;;  %v118_v3 = vsel %vm117_vm2, %v116_v63, %v114_v61 }
  0x8c   :  { %v76_v57 = vpop.xlane.xlu1 %75 }
  0x8d   :  { %v91_v59 = vmul.f32 %v83_v39, %v76_v57  ;;  %v64_v60 = vpop.xlane.xlu0 %63 }
  0x8e   :  { %v87_v62 = vmul.f32 %v83_v39, %v64_v60 }
  0x8f   :  { %v128_v0 = vperm.slane %v91_v59, %v119_v54 }
  0x90   :  { %v120_v1 = vperm.slane %v87_v62, %v119_v54 }
  0x91   :  { %v129_v4 = vsel %vm121_vm3, %v128_v0, %v127_v2 }
  0x92   :  { %v122_v5 = vsel %vm121_vm3, %v120_v1, %v118_v3 }
  0x93   :  { %v131_v6 = vsel %vm130_vm4, %v129_v4, %v122_v5 }
  0x94   :  { %204 = vmatmul.msk.f32.vlgmr.msra.gmra.mxu0 %vm132_vm5, %v131_v6 }
 0x111   :  { %v152_v9 = vpop.f32.mrf.mxu0 }
 0x112   :  { %v153_v10 = vadd.f32 %v211_v8, %v152_v9 }
 0x114   :  { %v155_v11 = vmax.f32 %v153_v10, 0.0 }
 0x116   :  { %205 = vmatmul.msk.f32.vlgmr.msra.gmra.mxu1 %vm161_vm6, %v155_v11 }
 0x193   :  { %v182_v13 = vpop.f32.mrf.mxu1 }
 0x194   :  { %v183_v14 = vadd.f32 %v212_v12, %v182_v13 }
 0x196   :  { %186 = vst.msk [vmem:[#allocation5] sm:$0x3] %vm185_vm7, %v183_v14 }
 0x197   :  { %197 = dma.vmem_to_hbm [thread:$0]  %s193_s13, 32, %s195_s3, [#allocation4]  }
 0x198   :  { %265 = dma.done.wait [#allocation4], 32  }
 0x199   :  { %266 = vsyncadd [#allocation4], 4294967264 }
 0x19a   :  { %202 = vsyncpa [#allocation3], 1 }
 0x19b   :  { %203 = vsyncpa [#allocation4], 1 }

</bundles_post_ra>
